<compile_context>
chip_gen: v7x
topology: tpu7x:2x2x1
jax: 0.10.0
libtpu: 0.0.40
codegen_flags: <defaults>
</compile_context>

<pallas_src>
import functools

import jax
import jax.numpy as jnp
from jax.experimental import pallas as pl
from jax.experimental.pallas import tpu as pltpu

NEG_SLOPE = 0.01  # nn.LeakyReLU default


def _res_block_kernel(x_ref, m_ref, b_ref, o_ref, pad_ref):
    """Fused out = conv1(leaky_relu(conv1(x))) + x for one image.

    x_ref:   (1, H, W*Cin)        lane-dense input slab
    m_ref:   (3, W*Cin, W*Cout)   block-banded conv matrices (one per kh)
    b_ref:   (1, W*Cout)          bias tiled along W
    o_ref:   (1, H, W*Cout)       lane-dense output slab
    pad_ref: (H+2, W*Cin) VMEM    row-padded working buffer (holds x, then y)
    """
    _, H, _ = o_ref.shape
    WC = x_ref.shape[2]

    # H-direction 'same' padding: zero the two halo rows in VMEM.
    zero_row = jnp.zeros((1, WC), jnp.float32)
    pad_ref[0:1, :] = zero_row
    pad_ref[H + 1:H + 2, :] = zero_row

    x = x_ref[0].astype(jnp.float32)      # (H, W*Cin) resident for the residual
    b = b_ref[...]                        # (1, W*Cout), hoisted broadcast

    def conv3x3():
        # One matmul per kernel row; each has K = W*Cin (=128 here), so the
        # MXU is driven at full width instead of nine tiny K=Cin pushes.
        acc = jnp.dot(pad_ref[0:H, :], m_ref[0],
                      preferred_element_type=jnp.float32)
        acc = acc + jnp.dot(pad_ref[1:H + 1, :], m_ref[1],
                            preferred_element_type=jnp.float32)
        acc = acc + jnp.dot(pad_ref[2:H + 2, :], m_ref[2],
                            preferred_element_type=jnp.float32)
        return acc + b                    # (H, W*Cout), still lane-dense

    # y = leaky_relu(conv1(x))
    pad_ref[1:H + 1, :] = x
    y = conv3x3()
    y = jnp.where(y > 0, y, NEG_SLOPE * y)

    # z = conv1(y)  -- y stays in VMEM, never written to HBM.
    pad_ref[1:H + 1, :] = y
    z = conv3x3()

    o_ref[0] = (z + x).astype(o_ref.dtype)


def _banded_conv_matrices(w_hwio, W):
    """w_hwio: (3, 3, Cin, Cout) -> M: (3, W*Cin, W*Cout).

    M[kh][(j+dw)*Cin + c, j*Cout + o] = w[kh, dw+1, c, o]  for 0 <= j+dw < W,
    i.e. each M[kh] is block tri-diagonal: it folds the three kw taps and the
    W-edge zero padding into a single matmul per kernel row.
    """
    mats = []
    for kh in range(3):
        m = jnp.zeros((W * w_hwio.shape[2], W * w_hwio.shape[3]),
                      dtype=w_hwio.dtype)
        for dw in (-1, 0, 1):
            band = jnp.eye(W, W, k=-dw, dtype=w_hwio.dtype)
            m = m + jnp.kron(band, w_hwio[kh, dw + 1])
        mats.append(m)
    return jnp.stack(mats, axis=0)


@jax.jit
def res_block_forward(x_nchw, w_conv1, b_conv1):
    """x_nchw: (N, Cin, H, W); w_conv1: (Cout, Cin, 3, 3) PyTorch layout; b_conv1: (Cout,)."""
    N, Cin, H, W = x_nchw.shape
    Cout = w_conv1.shape[0]
    assert Cin == Cout, "residual add requires in_channel == out_channel"

    # NCHW -> NHWC -> lane-dense (N, H, W*Cin).  (Whole function is jitted so
    # XLA fuses these layout ops with the surrounding graph.)
    x_flat = jnp.transpose(x_nchw, (0, 2, 3, 1)).reshape(N, H, W * Cin)
    # (Cout, Cin, 3, 3) -> (3, 3, Cin, Cout) -> block-banded matmul matrices.
    w_hwio = jnp.transpose(w_conv1, (2, 3, 1, 0)).astype(jnp.float32)
    m = _banded_conv_matrices(w_hwio, W)                       # (3, W*Cin, W*Cout)
    b_flat = jnp.tile(b_conv1.astype(jnp.float32), W).reshape(1, W * Cout)

    flops = 2 * 2 * 3 * N * H * (W * Cin) * (W * Cout)          # 2 convs x 3 matmuls
    bytes_accessed = 4 * (x_flat.size + N * H * W * Cout + m.size + b_flat.size)

    out_flat = pl.pallas_call(
        _res_block_kernel,
        out_shape=jax.ShapeDtypeStruct((N, H, W * Cout), x_nchw.dtype),
        grid_spec=pltpu.PrefetchScalarGridSpec(
            num_scalar_prefetch=0,
            grid=(N,),
            in_specs=[
                pl.BlockSpec((1, H, W * Cin), lambda n: (n, 0, 0)),
                pl.BlockSpec((3, W * Cin, W * Cout), lambda n: (0, 0, 0)),
                pl.BlockSpec((1, W * Cout), lambda n: (0, 0)),
            ],
            out_specs=pl.BlockSpec((1, H, W * Cout), lambda n: (n, 0, 0)),
            scratch_shapes=[pltpu.VMEM((H + 2, W * Cin), jnp.float32)],
        ),
        compiler_params=pltpu.CompilerParams(
            dimension_semantics=("parallel",)),
        cost_estimate=pl.CostEstimate(
            flops=flops, transcendentals=0, bytes_accessed=bytes_accessed),
    )(x_flat, m, b_flat)

    # Back to PyTorch's NCHW.
    return jnp.transpose(out_flat.reshape(N, H, W, Cout), (0, 3, 1, 2))


if __name__ == "__main__":
    # Residual add forces in_channel == out_channel; W*C = 128 -> lane-dense.
    N, C, H, W = 2, 8, 16, 16

    key = jax.random.PRNGKey(0)
    kx, kw, kb = jax.random.split(key, 3)

    x = jax.random.normal(kx, (N, C, H, W), dtype=jnp.float32)
    # conv1 parameters (PyTorch Conv2d weight layout: (Cout, Cin, 3, 3)).
    fan_in = C * 3 * 3
    bound = 1.0 / (fan_in ** 0.5)
    w_conv1 = jax.random.uniform(kw, (C, C, 3, 3), jnp.float32, -bound, bound)
    b_conv1 = jax.random.uniform(kb, (C,), jnp.float32, -bound, bound)
    # TODO(synk): conv2 exists in __init__ but is never used in forward; omitted.

    out = res_block_forward(x, w_conv1, b_conv1)
    jax.block_until_ready(out)

    # Sanity check against a pure-JAX conv reference.
    def ref(x, w, b):
        dn = jax.lax.conv_dimension_numbers(x.shape, w.shape,
                                            ("NCHW", "OIHW", "NCHW"))

        def conv(v):
            return jax.lax.conv_general_dilated(
                v, w, (1, 1), "SAME",
                dimension_numbers=dn) + b.reshape(1, -1, 1, 1)

        y = conv(x)
        y = jnp.where(y > 0, y, NEG_SLOPE * y)
        return conv(y) + x

    expected = ref(x, w_conv1, b_conv1)
    assert out.shape == (N, C, H, W)
    assert jnp.allclose(out, expected, atol=1e-4, rtol=1e-4)
    print("KERNEL_OK")
</pallas_src>

<mosaic_0001>
module attributes {stable_mosaic.version = 11 : i64} {
  func.func @_res_block_kernel(%arg0: i32, %arg1: memref<1x16x128xf32, #tpu.memory_space<vmem>>, %arg2: memref<3x128x128xf32, #tpu.memory_space<vmem>>, %arg3: memref<1x128xf32, #tpu.memory_space<vmem>>, %arg4: memref<1x16x128xf32, #tpu.memory_space<vmem>>, %arg5: memref<18x128xf32, #tpu.memory_space<vmem>>) attributes {dimension_semantics = [#tpu.dimension_semantics<parallel>], iteration_bounds = array<i64: 2>, scalar_prefetch = 0 : i64, scratch_operands = 1 : i64, tpu.core_type = #tpu.core_type<tc>, window_params = [{transform_indices = @transform_0, window_bounds = array<i64: 1, 16, 128>}, {pipeline_mode = #tpu.pipeline_mode<synchronous>, transform_indices = @transform_1, window_bounds = array<i64: 3, 128, 128>}, {pipeline_mode = #tpu.pipeline_mode<synchronous>, transform_indices = @transform_2, window_bounds = array<i64: 1, 128>}, {transform_indices = @transform_3, window_bounds = array<i64: 1, 16, 128>}]} {
    %cst = arith.constant 0.000000e+00 : f32
    %0 = vector.broadcast %cst : f32 to vector<1x128xf32>
    %c0 = arith.constant 0 : index
    %c0_0 = arith.constant 0 : index
    %1 = vector.load %arg5[%c0, %c0_0] : memref<18x128xf32, #tpu.memory_space<vmem>>, vector<1x128xf32>
    tpu.vector_store %arg5[%c0, %c0_0], %0 {strides = array<i32>} : memref<18x128xf32, #tpu.memory_space<vmem>>, vector<1x128xf32>,
    %c17 = arith.constant 17 : index
    %c0_1 = arith.constant 0 : index
    %2 = vector.load %arg5[%c17, %c0_1] : memref<18x128xf32, #tpu.memory_space<vmem>>, vector<1x128xf32>
    tpu.vector_store %arg5[%c17, %c0_1], %0 {strides = array<i32>} : memref<18x128xf32, #tpu.memory_space<vmem>>, vector<1x128xf32>,
    %c0_2 = arith.constant 0 : index
    %c0_3 = arith.constant 0 : index
    %c0_4 = arith.constant 0 : index
    %3 = vector.load %arg1[%c0_2, %c0_3, %c0_4] : memref<1x16x128xf32, #tpu.memory_space<vmem>>, vector<1x16x128xf32>
    %4 = vector.shape_cast %3 : vector<1x16x128xf32> to vector<16x128xf32>
    %c0_5 = arith.constant 0 : index
    %c0_6 = arith.constant 0 : index
    %5 = vector.load %arg3[%c0_5, %c0_6] : memref<1x128xf32, #tpu.memory_space<vmem>>, vector<1x128xf32>
    %c1 = arith.constant 1 : index
    %c0_7 = arith.constant 0 : index
    %6 = vector.load %arg5[%c1, %c0_7] : memref<18x128xf32, #tpu.memory_space<vmem>>, vector<16x128xf32>
    tpu.vector_store %arg5[%c1, %c0_7], %4 {strides = array<i32>} : memref<18x128xf32, #tpu.memory_space<vmem>>, vector<16x128xf32>,
    %c0_8 = arith.constant 0 : index
    %c0_9 = arith.constant 0 : index
    %7 = vector.load %arg5[%c0_8, %c0_9] : memref<18x128xf32, #tpu.memory_space<vmem>>, vector<16x128xf32>
    %c0_10 = arith.constant 0 : index
    %c0_11 = arith.constant 0 : index
    %c0_12 = arith.constant 0 : index
    %8 = vector.load %arg2[%c0_10, %c0_11, %c0_12] : memref<3x128x128xf32, #tpu.memory_space<vmem>>, vector<1x128x128xf32>
    %9 = vector.shape_cast %8 : vector<1x128x128xf32> to vector<128x128xf32>
    %cst_13 = arith.constant dense<0.000000e+00> : vector<16x128xf32>
    %10 = tpu.matmul %7, %9, %cst_13 {dimension_numbers = #tpu.dot_dimension_numbers<[1], [0], [0], [1], [0, 0, 1, 1], [], []>} : vector<16x128xf32>, vector<128x128xf32>, vector<16x128xf32> -> vector<16x128xf32>
    %c1_14 = arith.constant 1 : index
    %c0_15 = arith.constant 0 : index
    %11 = vector.load %arg5[%c1_14, %c0_15] : memref<18x128xf32, #tpu.memory_space<vmem>>, vector<16x128xf32>
    %c1_16 = arith.constant 1 : index
    %c0_17 = arith.constant 0 : index
    %c0_18 = arith.constant 0 : index
    %12 = vector.load %arg2[%c1_16, %c0_17, %c0_18] : memref<3x128x128xf32, #tpu.memory_space<vmem>>, vector<1x128x128xf32>
    %13 = vector.shape_cast %12 : vector<1x128x128xf32> to vector<128x128xf32>
    %cst_19 = arith.constant dense<0.000000e+00> : vector<16x128xf32>
    %14 = tpu.matmul %11, %13, %cst_19 {dimension_numbers = #tpu.dot_dimension_numbers<[1], [0], [0], [1], [0, 0, 1, 1], [], []>} : vector<16x128xf32>, vector<128x128xf32>, vector<16x128xf32> -> vector<16x128xf32>
    %15 = arith.addf %10, %14 : vector<16x128xf32>
    %c2 = arith.constant 2 : index
    %c0_20 = arith.constant 0 : index
    %16 = vector.load %arg5[%c2, %c0_20] : memref<18x128xf32, #tpu.memory_space<vmem>>, vector<16x128xf32>
    %c2_21 = arith.constant 2 : index
    %c0_22 = arith.constant 0 : index
    %c0_23 = arith.constant 0 : index
    %17 = vector.load %arg2[%c2_21, %c0_22, %c0_23] : memref<3x128x128xf32, #tpu.memory_space<vmem>>, vector<1x128x128xf32>
    %18 = vector.shape_cast %17 : vector<1x128x128xf32> to vector<128x128xf32>
    %cst_24 = arith.constant dense<0.000000e+00> : vector<16x128xf32>
    %19 = tpu.matmul %16, %18, %cst_24 {dimension_numbers = #tpu.dot_dimension_numbers<[1], [0], [0], [1], [0, 0, 1, 1], [], []>} : vector<16x128xf32>, vector<128x128xf32>, vector<16x128xf32> -> vector<16x128xf32>
    %20 = arith.addf %15, %19 : vector<16x128xf32>
    %21 = vector.broadcast %5 : vector<1x128xf32> to vector<16x128xf32>
    %22 = arith.addf %20, %21 : vector<16x128xf32>
    %cst_25 = arith.constant 0.000000e+00 : f32
    %23 = vector.broadcast %cst_25 : f32 to vector<16x128xf32>
    %24 = arith.cmpf ogt, %22, %23 : vector<16x128xf32>
    %cst_26 = arith.constant 0.00999999977 : f32
    %25 = vector.broadcast %cst_26 : f32 to vector<16x128xf32>
    %26 = arith.mulf %25, %22 : vector<16x128xf32>
    %27 = arith.select %24, %22, %26 : vector<16x128xi1>, vector<16x128xf32>
    %c1_27 = arith.constant 1 : index
    %c0_28 = arith.constant 0 : index
    %28 = vector.load %arg5[%c1_27, %c0_28] : memref<18x128xf32, #tpu.memory_space<vmem>>, vector<16x128xf32>
    tpu.vector_store %arg5[%c1_27, %c0_28], %27 {strides = array<i32>} : memref<18x128xf32, #tpu.memory_space<vmem>>, vector<16x128xf32>,
    %c0_29 = arith.constant 0 : index
    %c0_30 = arith.constant 0 : index
    %29 = vector.load %arg5[%c0_29, %c0_30] : memref<18x128xf32, #tpu.memory_space<vmem>>, vector<16x128xf32>
    %c0_31 = arith.constant 0 : index
    %c0_32 = arith.constant 0 : index
    %c0_33 = arith.constant 0 : index
    %30 = vector.load %arg2[%c0_31, %c0_32, %c0_33] : memref<3x128x128xf32, #tpu.memory_space<vmem>>, vector<1x128x128xf32>
    %31 = vector.shape_cast %30 : vector<1x128x128xf32> to vector<128x128xf32>
    %cst_34 = arith.constant dense<0.000000e+00> : vector<16x128xf32>
    %32 = tpu.matmul %29, %31, %cst_34 {dimension_numbers = #tpu.dot_dimension_numbers<[1], [0], [0], [1], [0, 0, 1, 1], [], []>} : vector<16x128xf32>, vector<128x128xf32>, vector<16x128xf32> -> vector<16x128xf32>
    %c1_35 = arith.constant 1 : index
    %c0_36 = arith.constant 0 : index
    %33 = vector.load %arg5[%c1_35, %c0_36] : memref<18x128xf32, #tpu.memory_space<vmem>>, vector<16x128xf32>
    %c1_37 = arith.constant 1 : index
    %c0_38 = arith.constant 0 : index
    %c0_39 = arith.constant 0 : index
    %34 = vector.load %arg2[%c1_37, %c0_38, %c0_39] : memref<3x128x128xf32, #tpu.memory_space<vmem>>, vector<1x128x128xf32>
    %35 = vector.shape_cast %34 : vector<1x128x128xf32> to vector<128x128xf32>
    %cst_40 = arith.constant dense<0.000000e+00> : vector<16x128xf32>
    %36 = tpu.matmul %33, %35, %cst_40 {dimension_numbers = #tpu.dot_dimension_numbers<[1], [0], [0], [1], [0, 0, 1, 1], [], []>} : vector<16x128xf32>, vector<128x128xf32>, vector<16x128xf32> -> vector<16x128xf32>
    %37 = arith.addf %32, %36 : vector<16x128xf32>
    %c2_41 = arith.constant 2 : index
    %c0_42 = arith.constant 0 : index
    %38 = vector.load %arg5[%c2_41, %c0_42] : memref<18x128xf32, #tpu.memory_space<vmem>>, vector<16x128xf32>
    %c2_43 = arith.constant 2 : index
    %c0_44 = arith.constant 0 : index
    %c0_45 = arith.constant 0 : index
    %39 = vector.load %arg2[%c2_43, %c0_44, %c0_45] : memref<3x128x128xf32, #tpu.memory_space<vmem>>, vector<1x128x128xf32>
    %40 = vector.shape_cast %39 : vector<1x128x128xf32> to vector<128x128xf32>
    %cst_46 = arith.constant dense<0.000000e+00> : vector<16x128xf32>
    %41 = tpu.matmul %38, %40, %cst_46 {dimension_numbers = #tpu.dot_dimension_numbers<[1], [0], [0], [1], [0, 0, 1, 1], [], []>} : vector<16x128xf32>, vector<128x128xf32>, vector<16x128xf32> -> vector<16x128xf32>
    %42 = arith.addf %37, %41 : vector<16x128xf32>
    %43 = vector.broadcast %5 : vector<1x128xf32> to vector<16x128xf32>
    %44 = arith.addf %42, %43 : vector<16x128xf32>
    %45 = arith.addf %44, %4 : vector<16x128xf32>
    %c0_47 = arith.constant 0 : index
    %c0_48 = arith.constant 0 : index
    %c0_49 = arith.constant 0 : index
    %46 = vector.load %arg4[%c0_47, %c0_48, %c0_49] : memref<1x16x128xf32, #tpu.memory_space<vmem>>, vector<1x16x128xf32>
    %47 = vector.shape_cast %46 : vector<1x16x128xf32> to vector<16x128xf32>
    %48 = vector.shape_cast %45 : vector<16x128xf32> to vector<1x16x128xf32>
    tpu.vector_store %arg4[%c0_47, %c0_48, %c0_49], %48 {strides = array<i32>} : memref<1x16x128xf32, #tpu.memory_space<vmem>>, vector<1x16x128xf32>,
    return
  }
  func.func @transform_0(%arg0: i32) -> (i32, i32, i32) {
    %c0_i32 = arith.constant 0 : i32
    %c0_i32_0 = arith.constant 0 : i32
    %c0_i32_1 = arith.constant 0 : i32
    return %arg0, %c0_i32, %c0_i32_0 : i32, i32, i32
  }
  func.func @transform_1(%arg0: i32) -> (i32, i32, i32) {
    %c0_i32 = arith.constant 0 : i32
    %c0_i32_0 = arith.constant 0 : i32
    %c0_i32_1 = arith.constant 0 : i32
    %c0_i32_2 = arith.constant 0 : i32
    return %c0_i32, %c0_i32_0, %c0_i32_1 : i32, i32, i32
  }
  func.func @transform_2(%arg0: i32) -> (i32, i32) {
    %c0_i32 = arith.constant 0 : i32
    %c0_i32_0 = arith.constant 0 : i32
    %c0_i32_1 = arith.constant 0 : i32
    return %c0_i32, %c0_i32_0 : i32, i32
  }
  func.func @transform_3(%arg0: i32) -> (i32, i32, i32) {
    %c0_i32 = arith.constant 0 : i32
    %c0_i32_0 = arith.constant 0 : i32
    %c0_i32_1 = arith.constant 0 : i32
    return %arg0, %c0_i32, %c0_i32_0 : i32, i32, i32
  }
}

</mosaic_0001>

<bundles_post_ra>
// kernel: tile.8
= control target key start
LH: loop header
LB: loop body
LE: loop exit
PB: predicated region body
PF: predicated region fallthrough
CT: control target
= control target key end

     0   :  { %s28_s0 = inlined_call_operand.vmem [shape: f32[8], index: 0, kind: input, shape index: {}]   ;;  %s29_s1 = inlined_call_operand.vmem [shape: f32[16,8], index: 1, kind: output, shape index: {}]  }
   0x1   :  { %v4_v0 = vld [vmem:[%s28_s0] ss:$0 sm:$0xff] }
   0x2   :  { %5 = vst [vmem:[%s29_s1] sm:$0xff] %v4_v0  ;;  %8 = vst [vmem:[%s29_s1 + $0x8] sm:$0xff] %v4_v0 }

// kernel: tile.9
= control target key start
LH: loop header
LB: loop body
LE: loop exit
PB: predicated region body
PF: predicated region fallthrough
CT: control target
= control target key end

     0   :  { %s131_s10 = smov 120   ;;  %s132_s11 = smov 104   ;;  %vm3_vm0 = vcmask 64512   ;;  %vm9_vm1 = vcmask 1048512   ;;  %vm15_vm2 = vcmask 982912   ;;  %vm21_vm3 = vcmask 917312   ;;  %s207_s0 = inlined_call_operand.vmem [shape: f32[16,8], index: 0, kind: input, shape index: {}]   ;;  %s208_s1 = inlined_call_operand.vmem [shape: f32[1,128], index: 1, kind: output, shape index: {}]  }
   0x1   :  { %v101_v0 = vld [vmem:[%s207_s0 + $0xf] sm:$0x1]   ;;  %v103_v1 = vld [vmem:[%s207_s0 + $0xd] sm:$0x1]   ;;  %v102_v2 = vld [vmem:[%s207_s0 + $0xe] sm:$0x1]  }
   0x2   :  { %7 = vrot.lane.b32.xlu0 %v101_v0, %s131_s10  ;;  %19 = vrot.lane.b32.xlu1 %v103_v1, %s132_s11  ;;  %v104_v3 = vld [vmem:[%s207_s0 + $0xc] sm:$0x1]   ;;  %s133_s16 = smov 112   ;;  %s134_s17 = smov 96   ;;  %v105_v4 = vld [vmem:[%s207_s0 + $0xb] sm:$0x1]  }
   0x3   :  { %v106_v5 = vld [vmem:[%s207_s0 + $0xa] sm:$0x1]   ;;  %v2_v6 = vld [vmem:[%s207_s0] sm:$0x1]   ;;  %s135_s24 = smov 88   ;;  %s136_s25 = smov 80  }
   0x4   :  { %4 = vst.msk [vmem:[#allocation0] sm:$0x1] %vm3_vm0, %v2_v6   ;;  %v107_v7 = vld [vmem:[%s207_s0 + $0x9] sm:$0x1]   ;;  %v108_v8 = vld [vmem:[%s207_s0 + $0x8] sm:$0x1]  }
   0x5   :  { %s137_s30 = smov 72   ;;  %s138_s2 = smov 64   ;;  %v109_v9 = vld [vmem:[%s207_s0 + $0x7] sm:$0x1]   ;;  %v110_v10 = vld [vmem:[%s207_s0 + $0x6] sm:$0x1]  }
   0x6   :  { %13 = vrot.lane.b32.xlu0 %v102_v2, %s133_s16  ;;  %25 = vrot.lane.b32.xlu1 %v104_v3, %s134_s17  ;;  %s139_s7 = smov 56   ;;  %s140_s8 = smov 48   ;;  %v111_v11 = vld [vmem:[%s207_s0 + $0x5] sm:$0x1]   ;;  %v112_v12 = vld [vmem:[%s207_s0 + $0x4] sm:$0x1]  }
   0x7   :  { %s141_s13 = smov 40   ;;  %s142_s14 = smov 32   ;;  %v113_v13 = vld [vmem:[%s207_s0 + $0x3] sm:$0x1]   ;;  %v114_v14 = vld [vmem:[%s207_s0 + $0x2] sm:$0x1]  }
   0x8   :  { %s143_s19 = smov 24   ;;  %s144_s20 = smov 16   ;;  %v115_v15 = vld [vmem:[%s207_s0 + $0x1] sm:$0x1]   ;;  %vm27_vm4 = vcmask 851712   ;;  %vm33_vm5 = vcmask 786112  }
   0x9   :  { %s145_s0 = smov 8   ;;  %vm39_vm6 = vcmask 720512   ;;  %vm45_vm7 = vcmask 654912   ;;  %vm51_vm8 = vcmask 589312   ;;  %vm57_vm9 = vcmask 523712  }
   0xa   :  { %31 = vrot.lane.b32.xlu0 %v105_v4, %s135_s24  ;;  %37 = vrot.lane.b32.xlu1 %v106_v5, %s136_s25  ;;  %vm63_vm10 = vcmask 458112   ;;  %vm69_vm11 = vcmask 392512   ;;  %vm75_vm12 = vcmask 326912   ;;  %vm81_vm13 = vcmask 261312  }
   0xb   :  { %vm87_vm14 = vcmask 195712   ;;  %vm93_vm15 = vcmask 130112  }
   0xe   :  { %43 = vrot.lane.b32.xlu0 %v107_v7, %s137_s30  ;;  %49 = vrot.lane.b32.xlu1 %v108_v8, %s138_s2 }
  0x12   :  { %55 = vrot.lane.b32.xlu0 %v109_v9, %s139_s7  ;;  %61 = vrot.lane.b32.xlu1 %v110_v10, %s140_s8 }
  0x16   :  { %67 = vrot.lane.b32.xlu0 %v111_v11, %s141_s13  ;;  %73 = vrot.lane.b32.xlu1 %v112_v12, %s142_s14 }
  0x1a   :  { %79 = vrot.lane.b32.xlu0 %v113_v13, %s143_s19  ;;  %85 = vrot.lane.b32.xlu1 %v114_v14, %s144_s20 }
  0x1e   :  { %91 = vrot.lane.b32.xlu0 %v115_v15, %s145_s0 }
  0x74   :  { %v8_v16 = vpop.permute.xlu0 %7   ;;  %v20_v17 = vpop.permute.xlu1 %19  }
  0x75   :  { %10 = vst.msk [vmem:[#allocation0] sm:$0x1] %vm9_vm1, %v8_v16  }
  0x78   :  { %v14_v18 = vpop.permute.xlu0 %13   ;;  %v26_v19 = vpop.permute.xlu1 %25  }
  0x79   :  { %16 = vst.msk [vmem:[#allocation0] sm:$0x1] %vm15_vm2, %v14_v18  }
  0x7a   :  { %22 = vst.msk [vmem:[#allocation0] sm:$0x1] %vm21_vm3, %v20_v17  }
  0x7b   :  { %28 = vst.msk [vmem:[#allocation0] sm:$0x1] %vm27_vm4, %v26_v19  }
  0x7c   :  { %v32_v20 = vpop.permute.xlu0 %31   ;;  %v38_v21 = vpop.permute.xlu1 %37  }
  0x7d   :  { %34 = vst.msk [vmem:[#allocation0] sm:$0x1] %vm33_vm5, %v32_v20  }
  0x7e   :  { %40 = vst.msk [vmem:[#allocation0] sm:$0x1] %vm39_vm6, %v38_v21  }
  0x80   :  { %v44_v22 = vpop.permute.xlu0 %43   ;;  %v50_v23 = vpop.permute.xlu1 %49  }
  0x81   :  { %46 = vst.msk [vmem:[#allocation0] sm:$0x1] %vm45_vm7, %v44_v22  }
  0x82   :  { %52 = vst.msk [vmem:[#allocation0] sm:$0x1] %vm51_vm8, %v50_v23  }
  0x84   :  { %v56_v24 = vpop.permute.xlu0 %55   ;;  %v62_v25 = vpop.permute.xlu1 %61  }
  0x85   :  { %58 = vst.msk [vmem:[#allocation0] sm:$0x1] %vm57_vm9, %v56_v24  }
  0x86   :  { %64 = vst.msk [vmem:[#allocation0] sm:$0x1] %vm63_vm10, %v62_v25  }
  0x88   :  { %v68_v26 = vpop.permute.xlu0 %67   ;;  %v74_v27 = vpop.permute.xlu1 %73  }
  0x89   :  { %70 = vst.msk [vmem:[#allocation0] sm:$0x1] %vm69_vm11, %v68_v26  }
  0x8a   :  { %76 = vst.msk [vmem:[#allocation0] sm:$0x1] %vm75_vm12, %v74_v27  }
  0x8c   :  { %v80_v28 = vpop.permute.xlu0 %79   ;;  %v86_v29 = vpop.permute.xlu1 %85  }
  0x8d   :  { %82 = vst.msk [vmem:[#allocation0] sm:$0x1] %vm81_vm13, %v80_v28  }
  0x8e   :  { %88 = vst.msk [vmem:[#allocation0] sm:$0x1] %vm87_vm14, %v86_v29  }
  0x90   :  { %v92_v30 = vpop.permute.xlu0 %91  }
  0x91   :  { %94 = vst.msk [vmem:[#allocation0] sm:$0x1] %vm93_vm15, %v92_v30  }
  0x98   :  { %v98_v31 = vld [vmem:[#allocation0] sm:$0x1] }
  0x99   :  { %100 = vst [vmem:[%s208_s1] sm:$0x1] %v98_v31 }

// kernel: res_block_forward.1
= control target key start
LH: loop header
LB: loop body
LE: loop exit
PB: predicated region body
PF: predicated region fallthrough
CT: control target
= control target key end

     0   :  { %s1453_s12 = smov 0   ;;  %s1712_s0 = inlined_call_operand.vmem [shape: f32[2,16,128], index: 0, kind: input, shape index: {}]   ;;  %s1713_s1 = inlined_call_operand.vmem [shape: f32[3,128,128], index: 1, kind: input, shape index: {}]   ;;  %s1714_s2 = inlined_call_operand.vmem [shape: f32[1,128], index: 2, kind: input, shape index: {}]   ;;  %s1715_s3 = inlined_call_operand.vmem [shape: f32[2,16,128], index: 3, kind: output, shape index: {}]  }
   0x1 LB: > { %s819_s13 = sadd.s32 4294967295, %s1430_s12   ;;  %p823_p0 = scmp.ge.s32.totalorder %s1430_s12, 1  ;;  %s1430_s12 = sphi %s1453_s12, %s13_s12  }
   0x2   : > { %p137_p1 = scmp.lt.s32.totalorder %s1430_s12, 3 }
   0x4   : > { %p138_p2 = pnand %p823_p0, %p137_p1 }
   0x5   : > { %v828_v0 = vld [vmem:[%s1713_s1 + $0x80] sm:$0xff] (!%p138_p2)  ;;  %v829_v1 = vld [vmem:[%s1713_s1 + $0x88] sm:$0xff] (!%p138_p2)  ;;  %v830_v2 = vld [vmem:[%s1713_s1 + $0x90] sm:$0xff] (!%p138_p2)  ;;  %p161_p3 = scmp.lt.s32.totalorder (!%p138_p2), %s819_s13, 1  ;;  %v1432_v5 = vmov (!%p138_p2), 0.0  }
   0x6   : > { %141 = sbr.rel (%p138_p2) target bundleno = 605 (0x25d), region = 32  ;;  %v1215_v3 = vpack.c.bf16 (!%p138_p2), %v829_v1, %v828_v0  ;;  %v831_v4 = vld [vmem:[%s1713_s1 + $0x98] sm:$0xff] (!%p138_p2)  ;;  %171 = vst [vmem:[#allocation2] sm:$0x1] (!%p138_p2), %v1432_v5  ;;  %172 = vst [vmem:[#allocation2 + $0x11] sm:$0x1] (!%p138_p2), %v1432_v5 }
   0x7   : > { %v1219_v6 = vpack.c.bf16 (!%p138_p2), %v831_v4, %v830_v2  ;;  %v832_v7 = vld [vmem:[%s1713_s1 + $0xa0] sm:$0xff] (!%p138_p2)  ;;  %v833_v8 = vld [vmem:[%s1713_s1 + $0xa8] sm:$0xff] (!%p138_p2)  ;;  %v834_v10 = vld [vmem:[%s1713_s1 + $0xb0] sm:$0xff] (!%p138_p2) }
   0x8   : > { %1216 = vmatprep.subr.bf16.mxu0 (!%p138_p2), %v1215_v3  ;;  %1312 = vmatprep.subr.bf16.mxu1 (!%p138_p2), %v1215_v3  ;;  %v1223_v9 = vpack.c.bf16 (!%p138_p2), %v833_v8, %v832_v7  ;;  %v835_v11 = vld [vmem:[%s1713_s1 + $0xb8] sm:$0xff] (!%p138_p2)  ;;  %v836_v15 = vld [vmem:[%s1713_s1 + $0xc0] sm:$0xff] (!%p138_p2)  ;;  %v837_v16 = vld [vmem:[%s1713_s1 + $0xc8] sm:$0xff] (!%p138_p2) }
   0x9   : > { %1218 = vmatpush3.bf16.msra.mxu0 (!%p138_p2), %v1215_v3  ;;  %1314 = vmatpush3.bf16.msra.mxu1 (!%p138_p2), %v1215_v3  ;;  %v1227_v14 = vpack.c.bf16 (!%p138_p2), %v835_v11, %v834_v10  ;;  %v1231_v17 = vpack.c.bf16 (!%p138_p2), %v837_v16, %v836_v15  ;;  %v838_v18 = vld [vmem:[%s1713_s1 + $0xd0] sm:$0xff] (!%p138_p2)  ;;  %v839_v19 = vld [vmem:[%s1713_s1 + $0xd8] sm:$0xff] (!%p138_p2)  ;;  %v840_v21 = vld [vmem:[%s1713_s1 + $0xe0] sm:$0xff] (!%p138_p2) }
   0xa   : > { %1220 = vmatprep.subr.bf16.mxu0 (!%p138_p2), %v1219_v6  ;;  %1316 = vmatprep.subr.bf16.mxu1 (!%p138_p2), %v1219_v6  ;;  %v1235_v20 = vpack.c.bf16 (!%p138_p2), %v839_v19, %v838_v18  ;;  %v841_v22 = vld [vmem:[%s1713_s1 + $0xe8] sm:$0xff] (!%p138_p2)  ;;  %v842_v24 = vld [vmem:[%s1713_s1 + $0xf0] sm:$0xff] (!%p138_p2)  ;;  %v843_v25 = vld [vmem:[%s1713_s1 + $0xf8] sm:$0xff] (!%p138_p2) }
   0xb   : > { %v1239_v23 = vpack.c.bf16 (!%p138_p2), %v841_v22, %v840_v21  ;;  %v1243_v26 = vpack.c.bf16 (!%p138_p2), %v843_v25, %v842_v24  ;;  %v180_v27 = vld [vmem:[%s1713_s1] sm:$0xff] (!%p138_p2)  ;;  %v181_v28 = vld [vmem:[%s1713_s1 + $0x8] sm:$0xff] (!%p138_p2)  ;;  %v182_v30 = vld [vmem:[%s1713_s1 + $0x10] sm:$0xff] (!%p138_p2) }
   0xc   : > { %v1530_v29 = vpack.c.bf16 (!%p138_p2), %v181_v28, %v180_v27  ;;  %v183_v31 = vld [vmem:[%s1713_s1 + $0x18] sm:$0xff] (!%p138_p2)  ;;  %v184_v34 = vld [vmem:[%s1713_s1 + $0x20] sm:$0xff] (!%p138_p2)  ;;  %v185_v35 = vld [vmem:[%s1713_s1 + $0x28] sm:$0xff] (!%p138_p2) }
   0xd   : > { %s1717_s13 = smov (!%p161_p3, %s819_s13), 1  ;;  %1222 = vmatpush3.bf16.msra.mxu0 %v1219_v6  ;;  %1318 = vmatpush3.bf16.msra.mxu1 %v1219_v6  ;;  %v1539_v32 = vpack.c.bf16 %v183_v31, %v182_v30  ;;  %v1551_v36 = vpack.c.bf16 %v185_v35, %v184_v34  ;;  %v186_v37 = vld [vmem:[%s1713_s1 + $0x30] sm:$0xff]  ;;  %v187_v38 = vld [vmem:[%s1713_s1 + $0x38] sm:$0xff]  ;;  %v188_v40 = vld [vmem:[%s1713_s1 + $0x40] sm:$0xff] }
   0xe   : > { %s895_s26 = sshll.u32 %s1717_s13, 4  ;;  %1224 = vmatprep.subr.bf16.mxu0 %v1223_v9  ;;  %1320 = vmatprep.subr.bf16.mxu1 %v1223_v9  ;;  %v1561_v39 = vpack.c.bf16 %v187_v38, %v186_v37  ;;  %v189_v41 = vld [vmem:[%s1713_s1 + $0x48] sm:$0xff]  ;;  %v190_v43 = vld [vmem:[%s1713_s1 + $0x50] sm:$0xff]  ;;  %v191_v44 = vld [vmem:[%s1713_s1 + $0x58] sm:$0xff] }
   0xf   : > { %s165_s4 = scalar_lea.vmem %s1712_s0, %s895_s26  ;;  %v1571_v42 = vpack.c.bf16 %v189_v41, %v188_v40  ;;  %v1581_v45 = vpack.c.bf16 %v191_v44, %v190_v43  ;;  %v192_v46 = vld [vmem:[%s1713_s1 + $0x60] sm:$0xff]  ;;  %v193_v47 = vld [vmem:[%s1713_s1 + $0x68] sm:$0xff]  ;;  %v194_v49 = vld [vmem:[%s1713_s1 + $0x70] sm:$0xff]  ;;  %s170_s21 = scalar_lea.vmem %s1715_s3, %s895_s26 }
  0x10   : > { %v1493_v12 = vld [vmem:[%s165_s4] sm:$0xff]  ;;  %v1495_v13 = vld [vmem:[%s165_s4 + $0x8] sm:$0xff]  ;;  %v1591_v48 = vpack.c.bf16 %v193_v47, %v192_v46  ;;  %v195_v50 = vld [vmem:[%s1713_s1 + $0x78] sm:$0xff] }
  0x11   : > { %176 = vst [vmem:[#allocation2 + $0x1] sm:$0xff] %v1493_v12  ;;  %1037 = vmatprep.mubr.f32.mxu0 %v1493_v12  ;;  %177 = vst [vmem:[#allocation2 + $0x9] sm:$0xff] %v1495_v13  ;;  %1226 = vmatpush3.bf16.msra.mxu0 %v1223_v9  ;;  %v1601_v51 = vpack.c.bf16 %v195_v50, %v194_v49  ;;  %v844_v52 = vld [vmem:[%s1713_s1 + $0x100] sm:$0xff]  ;;  %v845_v53 = vld [vmem:[%s1713_s1 + $0x108] sm:$0xff] }
  0x12   : > { %1322 = vmatpush3.bf16.msra.mxu1 %v1223_v9  ;;  %1228 = vmatprep.subr.bf16.mxu0 %v1227_v14  ;;  %v1611_v54 = vpack.c.bf16 %v845_v53, %v844_v52  ;;  %v846_v55 = vld [vmem:[%s1713_s1 + $0x110] sm:$0xff]  ;;  %v847_v56 = vld [vmem:[%s1713_s1 + $0x118] sm:$0xff]  ;;  %v848_v60 = vld [vmem:[%s1713_s1 + $0x120] sm:$0xff] }
  0x13   : > { %1324 = vmatprep.subr.bf16.mxu1 %v1227_v14  ;;  %v1621_v58 = vpack.c.bf16 %v847_v56, %v846_v55  ;;  %v849_v61 = vld [vmem:[%s1713_s1 + $0x128] sm:$0xff]  ;;  %v850_v63 = vld [vmem:[%s1713_s1 + $0x130] sm:$0xff]  ;;  %v851_v0 = vld [vmem:[%s1713_s1 + $0x138] sm:$0xff] }
  0x14   : > { %v1631_v62 = vpack.c.bf16 %v849_v61, %v848_v60  ;;  %v1641_v1 = vpack.c.bf16 %v851_v0, %v850_v63  ;;  %v852_v2 = vld [vmem:[%s1713_s1 + $0x140] sm:$0xff]  ;;  %v853_v3 = vld [vmem:[%s1713_s1 + $0x148] sm:$0xff]  ;;  %v854_v5 = vld [vmem:[%s1713_s1 + $0x150] sm:$0xff] }
  0x15   : > { %1230 = vmatpush3.bf16.msra.mxu0 %v1227_v14  ;;  %v1651_v4 = vpack.c.bf16 %v853_v3, %v852_v2  ;;  %v855_v6 = vld [vmem:[%s1713_s1 + $0x158] sm:$0xff]  ;;  %v856_v8 = vld [vmem:[%s1713_s1 + $0x160] sm:$0xff]  ;;  %v857_v9 = vld [vmem:[%s1713_s1 + $0x168] sm:$0xff] }
  0x16   : > { %1326 = vmatpush3.bf16.msra.mxu1 %v1227_v14  ;;  %1232 = vmatprep.subr.bf16.mxu0 %v1231_v17  ;;  %v1299_v7 = vpack.c.bf16 %v855_v6, %v854_v5  ;;  %v1303_v10 = vpack.c.bf16 %v857_v9, %v856_v8  ;;  %v858_v11 = vld [vmem:[%s1713_s1 + $0x170] sm:$0xff]  ;;  %v859_v14 = vld [vmem:[%s1713_s1 + $0x178] sm:$0xff] }
  0x17   : > { %1328 = vmatprep.subr.bf16.mxu1 %v1231_v17  ;;  %v1307_v15 = vpack.c.bf16 %v859_v14, %v858_v11 }
  0x18   : > { %v178_v33 = vld [vmem:[#allocation2] sm:$0xff]  ;;  %v179_v57 = vld [vmem:[#allocation2 + $0x8] sm:$0xff] }
  0x19   : > { %1234 = vmatpush3.bf16.msra.mxu0 %v1231_v17  ;;  %v365_v59 = vld [vmem:[#allocation2 + $0x2] sm:$0xff]  ;;  %v366_v16 = vld [vmem:[#allocation2 + $0xa] sm:$0xff] }
  0x1a   : > { %1330 = vmatpush3.bf16.msra.mxu1 %v1231_v17  ;;  %1236 = vmatprep.subr.bf16.mxu0 %v1235_v20  ;;  %v860_v17 = vld [vmem:[%s1714_s2] ss:$0 sm:$0xff] }
  0x1b   : > { %1332 = vmatprep.subr.bf16.mxu1 %v1235_v20 }
  0x1d   : > { %1238 = vmatpush3.bf16.msra.mxu0 %v1235_v20 }
  0x1e   : > { %1334 = vmatpush3.bf16.msra.mxu1 %v1235_v20  ;;  %1240 = vmatprep.subr.bf16.mxu0 %v1239_v23 }
  0x1f   : > { %1336 = vmatprep.subr.bf16.mxu1 %v1239_v23 }
  0x21   : > { %1242 = vmatpush3.bf16.msra.mxu0 %v1239_v23 }
  0x22   : > { %1338 = vmatpush3.bf16.msra.mxu1 %v1239_v23  ;;  %1244 = vmatprep.subr.bf16.mxu0 %v1243_v26 }
  0x23   : > { %1340 = vmatprep.subr.bf16.mxu1 %v1243_v26 }
  0x25   : > { %1246 = vmatpush3.bf16.msra.mxu0 %v1243_v26 }
  0x26   : > { %1342 = vmatpush3.bf16.msra.mxu1 %v1243_v26  ;;  %1248 = vmatprep.subr.bf16.mxu0 %v1530_v29 }
  0x27   : > { %1344 = vmatprep.subr.bf16.mxu1 %v1530_v29 }
  0x28   : > { %1038 = vmatmul.mubr.f32.vlgmr.msra.gmra.mrb[0].mxu0 %v1495_v13 }
  0x29   : > { %1250 = vmatpush3.bf16.msra.mxu0 %v1530_v29  ;;  %1072 = vmatprep.mubr.f32.mxu0 %v178_v33 }
  0x2a   : > { %1252 = vmatprep.subr.bf16.mxu0 %v1539_v32 }
  0x2d   : > { %1254 = vmatpush3.bf16.msra.mxu0 %v1539_v32 }
  0x2e   : > { %1256 = vmatprep.subr.bf16.mxu0 %v1551_v36 }
  0x31   : > { %1258 = vmatpush3.bf16.msra.mxu0 %v1551_v36 }
  0x32   : > { %1260 = vmatprep.subr.bf16.mxu0 %v1561_v39 }
  0x35   : > { %1262 = vmatpush3.bf16.msra.mxu0 %v1561_v39 }
  0x36   : > { %1264 = vmatprep.subr.bf16.mxu0 %v1571_v42 }
  0x39   : > { %1266 = vmatpush3.bf16.msra.mxu0 %v1571_v42 }
  0x3a   : > { %1268 = vmatprep.subr.bf16.mxu0 %v1581_v45 }
  0x3d   : > { %1270 = vmatpush3.bf16.msra.mxu0 %v1581_v45 }
  0x3e   : > { %1272 = vmatprep.subr.bf16.mxu0 %v1591_v48 }
  0x41   : > { %1274 = vmatpush3.bf16.msra.mxu0 %v1591_v48 }
  0x42   : > { %1276 = vmatprep.subr.bf16.mxu0 %v1601_v51 }
  0x45   : > { %1278 = vmatpush3.bf16.msra.mxu0 %v1601_v51 }
  0x46   : > { %1280 = vmatprep.subr.bf16.mxu0 %v1611_v54 }
  0x48   : > { %1073 = vmatmul.mubr.f32.vlgmr.msra.gmra.mrb[0].mxu0 %v179_v57 }
  0x49   : > { %1282 = vmatpush3.bf16.msra.mxu0 %v1611_v54  ;;  %1107 = vmatprep.mubr.f32.mxu0 %v365_v59 }
  0x4a   : > { %1284 = vmatprep.subr.bf16.mxu0 %v1621_v58 }
  0x4d   : > { %1286 = vmatpush3.bf16.msra.mxu0 %v1621_v58 }
  0x4e   : > { %1288 = vmatprep.subr.bf16.mxu0 %v1631_v62 }
  0x51   : > { %1290 = vmatpush3.bf16.msra.mxu0 %v1631_v62 }
  0x52   : > { %1292 = vmatprep.subr.bf16.mxu0 %v1641_v1 }
  0x55   : > { %1294 = vmatpush3.bf16.msra.mxu0 %v1641_v1 }
  0x56   : > { %1296 = vmatprep.subr.bf16.mxu0 %v1651_v4 }
  0x59   : > { %1298 = vmatpush3.bf16.msra.mxu0 %v1651_v4 }
  0x5a   : > { %1300 = vmatprep.subr.bf16.mxu0 %v1299_v7 }
  0x5d   : > { %1302 = vmatpush3.bf16.msra.mxu0 %v1299_v7 }
  0x5e   : > { %1304 = vmatprep.subr.bf16.mxu0 %v1303_v10 }
  0x61   : > { %1306 = vmatpush3.bf16.msra.mxu0 %v1303_v10 }
  0x62   : > { %1308 = vmatprep.subr.bf16.mxu0 %v1307_v15 }
  0x65   : > { %1310 = vmatpush3.bf16.msra.mxu0 %v1307_v15 }
  0x68   : > { %1108 = vmatmul.mubr.f32.vlgmr.msra.gmra.mrb[0].mxu0 %v366_v16 }
 0x13b   : > { %v1109_v18 = vpop.f32.mrb[0].mxu0 }
 0x13c   : > { %v468_v19 = vadd.f32 %v1109_v18, %v860_v17  ;;  %v450_v20 = vpop.f32.mrb[1].mxu0 }
 0x13d   : > { %v467_v21 = vadd.f32 %v860_v17, %v450_v20 }
 0x13e   : > { %vm470_vm0 = vcmp.gt.f32.partialorder %v468_v19, 0.0  ;;  %v472_v22 = vmul.f32 0.01, %v468_v19 }
 0x13f   : > { %vm469_vm1 = vcmp.gt.f32.partialorder %v467_v21, 0.0  ;;  %v471_v23 = vmul.f32 0.01, %v467_v21 }
 0x140   : > { %v474_v24 = vsel %vm470_vm0, %v468_v19, %v472_v22 }
 0x141   : > { %476 = vst [vmem:[#allocation2 + $0x9] sm:$0xff] %v474_v24  ;;  %v473_v25 = vsel %vm469_vm1, %v467_v21, %v471_v23 }
 0x142   : > { %475 = vst [vmem:[#allocation2 + $0x1] sm:$0xff] %v473_v25  ;;  %1142 = vmatprep.mubr.f32.mxu1 %v473_v25 }
 0x143   : > { %1143 = vmatmul.mubr.f32.vlgmr.msra.gmra.mrb[0].mxu1 %v474_v24 }
 0x144   : > { %1346 = vmatpush3.bf16.msra.mxu1 %v1530_v29 }
 0x145   : > { %1348 = vmatprep.subr.bf16.mxu1 %v1539_v32 }
 0x148   : > { %1350 = vmatpush3.bf16.msra.mxu1 %v1539_v32  ;;  %v664_v29 = vld [vmem:[#allocation2 + $0xa] sm:$0xff] }
 0x149   : > { %v477_v26 = vld [vmem:[#allocation2] sm:$0xff]  ;;  %1352 = vmatprep.subr.bf16.mxu1 %v1551_v36  ;;  %v478_v27 = vld [vmem:[#allocation2 + $0x8] sm:$0xff] }
 0x14a   : > { %1177 = vmatprep.mubr.f32.mxu1 %v477_v26  ;;  %v663_v28 = vld [vmem:[#allocation2 + $0x2] sm:$0xff] }
 0x14c   : > { %1354 = vmatpush3.bf16.msra.mxu1 %v1551_v36 }
 0x14d   : > { %1356 = vmatprep.subr.bf16.mxu1 %v1561_v39 }
 0x150   : > { %1358 = vmatpush3.bf16.msra.mxu1 %v1561_v39 }
 0x151   : > { %1360 = vmatprep.subr.bf16.mxu1 %v1571_v42 }
 0x154   : > { %1362 = vmatpush3.bf16.msra.mxu1 %v1571_v42 }
 0x155   : > { %1364 = vmatprep.subr.bf16.mxu1 %v1581_v45 }
 0x158   : > { %1366 = vmatpush3.bf16.msra.mxu1 %v1581_v45 }
 0x159   : > { %1368 = vmatprep.subr.bf16.mxu1 %v1591_v48 }
 0x15c   : > { %1370 = vmatpush3.bf16.msra.mxu1 %v1591_v48 }
 0x15d   : > { %1372 = vmatprep.subr.bf16.mxu1 %v1601_v51 }
 0x160   : > { %1374 = vmatpush3.bf16.msra.mxu1 %v1601_v51 }
 0x161   : > { %1376 = vmatprep.subr.bf16.mxu1 %v1611_v54 }
 0x163   : > { %1178 = vmatmul.mubr.f32.vlgmr.msra.gmra.mrb[0].mxu1 %v478_v27 }
 0x164   : > { %1378 = vmatpush3.bf16.msra.mxu1 %v1611_v54  ;;  %1212 = vmatprep.mubr.f32.mxu1 %v663_v28 }
 0x165   : > { %1380 = vmatprep.subr.bf16.mxu1 %v1621_v58 }
 0x168   : > { %1382 = vmatpush3.bf16.msra.mxu1 %v1621_v58 }
 0x169   : > { %1384 = vmatprep.subr.bf16.mxu1 %v1631_v62 }
 0x16c   : > { %1386 = vmatpush3.bf16.msra.mxu1 %v1631_v62 }
 0x16d   : > { %1388 = vmatprep.subr.bf16.mxu1 %v1641_v1 }
 0x170   : > { %1390 = vmatpush3.bf16.msra.mxu1 %v1641_v1 }
 0x171   : > { %1392 = vmatprep.subr.bf16.mxu1 %v1651_v4 }
 0x174   : > { %1394 = vmatpush3.bf16.msra.mxu1 %v1651_v4 }
 0x175   : > { %1396 = vmatprep.subr.bf16.mxu1 %v1299_v7 }
 0x178   : > { %1398 = vmatpush3.bf16.msra.mxu1 %v1299_v7 }
 0x179   : > { %1400 = vmatprep.subr.bf16.mxu1 %v1303_v10 }
 0x17c   : > { %1402 = vmatpush3.bf16.msra.mxu1 %v1303_v10 }
 0x17d   : > { %1404 = vmatprep.subr.bf16.mxu1 %v1307_v15 }
 0x180   : > { %1406 = vmatpush3.bf16.msra.mxu1 %v1307_v15 }
 0x183   : > { %1213 = vmatmul.mubr.f32.vlgmr.msra.gmra.mrb[0].mxu1 %v664_v29 }
 0x256   : > { %v1214_v30 = vpop.f32.mrb[0].mxu1 }
 0x257   : > { %v759_v31 = vadd.f32 %v1214_v30, %v860_v17  ;;  %v747_v32 = vpop.f32.mrb[1].mxu1 }
 0x258   : > { %v758_v33 = vadd.f32 %v860_v17, %v747_v32 }
 0x259   : > { %v761_v34 = vadd.f32 %v759_v31, %v1495_v13 }
 0x25a   : > { %v760_v35 = vadd.f32 %v758_v33, %v1493_v12 }
 0x25b   : > { %763 = vst [vmem:[%s170_s21 + $0x8] sm:$0xff] %v761_v34 }
 0x25c   : > { %762 = vst [vmem:[%s170_s21] sm:$0xff] %v760_v35 }
 0x25d PF: > { %s13_s12 = sadd.s32 1, %s1430_s12  }
 0x25e   : > { %p10_p4 = scmp.ge.s32.totalorder %s13_s12, 4  }
 0x260   :  { %12 = sbr.rel (!%p10_p4) target bundleno = 1 (0x1), region = 64 }

</bundles_post_ra>
